<compile_context>
chip_gen: v7x
topology: tpu7x:2x2x1
jax: 0.10.0
libtpu: 0.0.40
codegen_flags: <defaults>
</compile_context>

<pallas_src>
import functools

import jax
import jax.numpy as jnp
from jax.experimental import pallas as pl
from jax.experimental.pallas import tpu as pltpu


def _identity_padding_kernel(x_ref, o_ref, *, data_cols, zero_cols):
    # x_ref: (b_blk, c_in * hw)          -- lane-dense last axis
    # o_ref: (b_blk, num_filters * hw)
    # Split write: real channels first, broadcast zeros into the padded region.
    o_ref[:, pl.ds(0, data_cols)] = x_ref[...]
    o_ref[:, pl.ds(data_cols, zero_cols)] = jnp.zeros(
        (o_ref.shape[0], zero_cols), dtype=o_ref.dtype)


def _sublane_pack(dtype):
    """Rows per 32-bit sublane for this dtype: 8 f32, 16 bf16, 32 int8."""
    return max(8, 32 // jnp.dtype(dtype).itemsize)


def _num_tensorcores():
    """Best-effort TensorCores-per-chip query (1 on v5e/v6e, 2 on v7x)."""
    try:
        info = pltpu.get_tpu_info()
        for name in ("num_cores", "core_count", "num_tensorcores",
                     "tensorcores_per_chip", "cores_per_chip"):
            v = getattr(info, name, None)
            if isinstance(v, int) and v > 0:
                return min(v, 2)
    except Exception:
        pass
    try:
        kind = jax.devices()[0].device_kind.lower()
        if "v7" in kind or "7x" in kind:
            return 2
    except Exception:
        pass
    return 1


def _pick_batch_block(n, bytes_per_row, dtype, num_cores):
    """Batch rows per grid step.

    Block's second-to-last dim must be a multiple of the sublane packing or
    equal to the full batch dim (Mosaic (8,128) layout rule).  Single-TC chips
    get one big block; v7x keeps >= num_cores grid steps (ideally a multiple of
    num_cores) under a tighter per-block budget for its 64 MiB VMEM.
    """
    pack = _sublane_pack(dtype)
    max_block_bytes = (4 << 20) if num_cores >= 2 else (8 << 20)
    cap = max(pack, max_block_bytes // max(1, bytes_per_row))

    if num_cores <= 1 or n <= pack:
        if n <= cap:
            return n                      # single block == full batch dim
        return max(pack, (cap // pack) * pack)

    # Multi-core: ensure >= num_cores grid steps, prefer a multiple of it.
    cap = min(cap, max(pack, -(-n // num_cores)))
    cap = max(pack, (cap // pack) * pack)
    best = cap
    b = cap
    while b >= pack:
        if (-(-n // b)) % num_cores == 0:
            best = b
            break
        b -= pack
    return min(best, n)


def identity_padding(x, num_filters, stride):
    """Pallas TPU implementation of IdentityPadding.forward (NCHW layout)."""
    n, c_in, h, w = x.shape
    num_zeros = num_filters - c_in
    assert num_zeros >= 0, "num_filters must be >= channels_in"
    h_out = (h - 1) // stride + 1
    w_out = (w - 1) // stride + 1
    hw = h_out * w_out

    # Fast paths: no channel padding -> the op is an identity / pure subsample;
    # don't burn an HBM read+write pass on a copy kernel.
    if num_zeros == 0:
        return x if stride == 1 else x[:, :, ::stride, ::stride]

    # MaxPool2d(kernel=1, stride=s) == strided spatial subsample (offset 0).
    # Expressed in XLA and offered for input fusion into the pallas call.
    x_sub = x[:, :, ::stride, ::stride] if stride > 1 else x
    # Lane-dense 2-D layout: flatten C*H_out*W_out onto the last (lane) axis.
    x_flat = x_sub.reshape(n, c_in * hw)

    data_cols = c_in * hw
    zero_cols = num_zeros * hw
    out_cols = num_filters * hw

    itemsize = jnp.dtype(x.dtype).itemsize
    bytes_per_row = (data_cols + out_cols) * itemsize   # in + out per batch row
    num_cores = _num_tensorcores()
    b_blk = _pick_batch_block(n, bytes_per_row, x.dtype, num_cores)
    grid_steps = pl.cdiv(n, b_blk)                       # ragged last block OK

    kernel = functools.partial(_identity_padding_kernel,
                               data_cols=data_cols, zero_cols=zero_cols)

    out_flat = pl.pallas_call(
        kernel,
        out_shape=jax.ShapeDtypeStruct((n, out_cols), x.dtype),
        grid_spec=pltpu.PrefetchScalarGridSpec(
            num_scalar_prefetch=0,
            grid=(grid_steps,),
            in_specs=[pl.BlockSpec((b_blk, data_cols), lambda i: (i, 0))],
            out_specs=pl.BlockSpec((b_blk, out_cols), lambda i: (i, 0)),
        ),
        compiler_params=pltpu.CompilerParams(
            dimension_semantics=("parallel",),
            vmem_limit_bytes=32 << 20,
            # Let XLA fuse the strided-slice + reshape producer into the pallas
            # input instead of materializing x_sub in HBM.
            allow_input_fusion=[True],
        ),
    )(x_flat)

    # TODO(synk): peak perf would fuse the zero channels into the downstream
    # residual-add kernel (treat c >= c_in as implicit zeros) so they never hit
    # HBM; kept standalone here to match the module boundary.
    return out_flat.reshape(n, num_filters, h_out, w_out)


def identity_padding_ref(x, num_filters, stride):
    """Pure-JAX reference matching the PyTorch module."""
    n, c_in, h, w = x.shape
    num_zeros = num_filters - c_in
    out = jnp.pad(x, ((0, 0), (0, num_zeros), (0, 0), (0, 0)))
    return out[:, :, ::stride, ::stride]


if __name__ == "__main__":
    # Module config consistent with a CIFAR10 ResNet downsampling shortcut.
    channels_in = 4
    num_filters = 8
    stride = 2

    key = jax.random.PRNGKey(0)
    x = jax.random.normal(key, (2, channels_in, 16, 16), dtype=jnp.float32)

    out = identity_padding(x, num_filters, stride)
    out = jax.block_until_ready(out)

    ref = identity_padding_ref(x, num_filters, stride)
    assert out.shape == (2, num_filters, 8, 8), out.shape
    assert jnp.array_equal(out, ref), "mismatch vs reference"

    # Also exercise the num_zeros == 0 fast path once.
    out_id = jax.block_until_ready(identity_padding(x, channels_in, stride))
    assert jnp.array_equal(out_id, identity_padding_ref(x, channels_in, stride))

    print("KERNEL_OK")
</pallas_src>

<mosaic_0001>
module attributes {stable_mosaic.version = 11 : i64} {
  func.func @_identity_padding_kernel(%arg0: i32, %arg1: memref<2x256xf32, #tpu.memory_space<vmem>>, %arg2: memref<2x512xf32, #tpu.memory_space<vmem>>) attributes {dimension_semantics = [#tpu.dimension_semantics<parallel>], iteration_bounds = array<i64: 1>, scalar_prefetch = 0 : i64, scratch_operands = 0 : i64, tpu.core_type = #tpu.core_type<tc>, window_params = [{transform_indices = @transform_0, window_bounds = array<i64: 2, 256>}, {transform_indices = @transform_1, window_bounds = array<i64: 2, 512>}]} {
    %c0 = arith.constant 0 : index
    %c0_0 = arith.constant 0 : index
    %0 = vector.load %arg1[%c0, %c0_0] : memref<2x256xf32, #tpu.memory_space<vmem>>, vector<2x256xf32>
    %c0_1 = arith.constant 0 : index
    %c0_2 = arith.constant 0 : index
    %1 = vector.load %arg2[%c0_1, %c0_2] : memref<2x512xf32, #tpu.memory_space<vmem>>, vector<2x256xf32>
    tpu.vector_store %arg2[%c0_1, %c0_2], %0 {strides = array<i32>} : memref<2x512xf32, #tpu.memory_space<vmem>>, vector<2x256xf32>,
    %cst = arith.constant 0.000000e+00 : f32
    %2 = vector.broadcast %cst : f32 to vector<2x256xf32>
    %c0_3 = arith.constant 0 : index
    %c256 = arith.constant 256 : index
    %3 = vector.load %arg2[%c0_3, %c256] : memref<2x512xf32, #tpu.memory_space<vmem>>, vector<2x256xf32>
    tpu.vector_store %arg2[%c0_3, %c256], %2 {strides = array<i32>} : memref<2x512xf32, #tpu.memory_space<vmem>>, vector<2x256xf32>,
    return
  }
  func.func @transform_0(%arg0: i32) -> (i32, i32) {
    %c0_i32 = arith.constant 0 : i32
    %c0_i32_0 = arith.constant 0 : i32
    return %arg0, %c0_i32 : i32, i32
  }
  func.func @transform_1(%arg0: i32) -> (i32, i32) {
    %c0_i32 = arith.constant 0 : i32
    %c0_i32_0 = arith.constant 0 : i32
    return %arg0, %c0_i32 : i32, i32
  }
}

</mosaic_0001>

<bundles_post_ra>
// kernel: tpu_custom_call.1
= control target key start
LH: loop header
LB: loop body
LE: loop exit
PB: predicated region body
PF: predicated region fallthrough
CT: control target
= control target key end

     0   :  { %6 = vsyncpa [#allocation3], 0  ;;  %s127_s0 = inlined_call_operand.hbm [shape: f32[2,256], index: 0, kind: input, shape index: {}]   ;;  %s128_s1 = inlined_call_operand.hbm [shape: f32[2,512], index: 1, kind: output, shape index: {}]  }
   0x1   :  { %7 = vsyncpa [#allocation4], 0  ;;  %s90_s6 = smov [#allocation2]   ;;  %s42_s10 = scalar_lea.hbm %s127_s0, 64 }
   0x2   :  { %s14_s7 = sshll.u32 %s90_s6, 4  ;;  %p43_p0 = scmp.ne.s32.totalorder %s127_s0, %s42_s10  ;;  %s15_s7 = int_to_ptr.vmem [resolvable:$true] %s14_s7 }
   0x3   :  { %p46_p1 = scmp.lt.u32.totalorder %s42_s10, %s127_s0 }
   0x5   :  { %p48_p2 = pnand %p46_p1, %p43_p0 }
   0x7   :  { %51 = shalt.err (!%p48_p2)
}
   0x8   :  { %s52_s15 = scalar_lea.vmem %s15_s7, 64  ;;  %p57_p4 = scmp.lt.s32.totalorder %s15_s7, %s15_s7 }
   0x9   :  { %p53_p3 = scmp.ne.s32.totalorder %s15_s7, %s52_s15  ;;  %p58_p5 = scmp.lt.s32.totalorder %s52_s15, %s52_s15 }
   0xb   :  { %p59_p6 = por %p58_p5, %p57_p4 }
   0xd   :  { %p60_p7 = pnand %p59_p6, %p53_p3 }
   0xf   :  { %63 = shalt.err (!%p60_p7)
}
  0x10   :  { %17 = dma.hbm_to_vmem [thread:$0]  %s127_s0, 64, %s15_s7, [#allocation3]  }
  0x11   :  { %86 = dma.done.wait [#allocation3], 64  }
  0x12   :  { %87 = vsyncadd [#allocation3], 4294967232  ;;  %v91_v0 = vmov 0.0   ;;  %s92_s18 = smov [#allocation5]   ;;  %v21_v1 = vld [vmem:[#allocation2] sm:$0xf] }
  0x13   :  { %23 = vst [vmem:[#allocation5 + $0x4] sm:$0xf] %v91_v0  ;;  %s30_s19 = sshll.u32 %s92_s18, 4  ;;  %22 = vst [vmem:[#allocation5] sm:$0xf] %v21_v1  ;;  %s31_s19 = int_to_ptr.vmem [resolvable:$true] %s30_s19 }
  0x14   :  { %s64_s20 = scalar_lea.vmem %s31_s19, 128  ;;  %p69_p9 = scmp.lt.s32.totalorder %s31_s19, %s31_s19 }
  0x15   :  { %p65_p8 = scmp.ne.s32.totalorder %s31_s19, %s64_s20  ;;  %p70_p10 = scmp.lt.s32.totalorder %s64_s20, %s64_s20 }
  0x17   :  { %p71_p11 = por %p70_p10, %p69_p9 }
  0x19   :  { %p72_p12 = pnand %p71_p11, %p65_p8 }
  0x1b   :  { %75 = shalt.err (!%p72_p12)
}
  0x1c   :  { %s76_s0 = scalar_lea.hbm %s128_s1, 128 }
  0x1d   :  { %p77_p13 = scmp.ne.s32.totalorder %s128_s1, %s76_s0  ;;  %p80_p0 = scmp.lt.u32.totalorder %s76_s0, %s128_s1 }
  0x1f   :  { %p82_p1 = pnand %p80_p0, %p77_p13 }
  0x21   :  { %85 = shalt.err (!%p82_p1)
}
  0x22   :  { %33 = dma.vmem_to_hbm [thread:$0]  %s31_s19, 128, %s128_s1, [#allocation4]  }
  0x23   :  { %88 = dma.done.wait [#allocation4], 128  }
  0x24   :  { %89 = vsyncadd [#allocation4], 4294967168 }
  0x25   :  { %37 = vsyncpa [#allocation3], 1 }
  0x26   :  { %38 = vsyncpa [#allocation4], 1 }

</bundles_post_ra>
